<compile_context>
chip_gen: v7x
topology: tpu7x:2x2x1
jax: 0.10.0
libtpu: 0.0.40
codegen_flags: <defaults>
</compile_context>

<pallas_src>
import functools
from dataclasses import dataclass
from typing import Any, Optional

import jax
import jax.numpy as jnp
import numpy as np
from jax.experimental import pallas as pl
from jax.experimental.pallas import tpu as pltpu

_MiB = 1024 * 1024


def _round_up(n: int, m: int) -> int:
    return ((n + m - 1) // m) * m


def _cdiv(a: int, b: int) -> int:
    return (a + b - 1) // b


# ----------------------------------------------------------------------------
# Per-generation configuration
# ----------------------------------------------------------------------------
@dataclass(frozen=True)
class TpuConfig:
    name: str
    lane_align: int                 # pad feature dims to this (MXU K-depth)
    tb_max: int                     # max batch-tile rows
    vmem_limit_bytes: Optional[int]  # scoped VMEM limit to request (None = default)
    vmem_budget: int                # planning budget (< limit, with margin)
    num_cores: int                  # TensorCores that can share the grid
    act_dtype: Any                  # dtype for the sigmoid/tanh math


def detect_tpu_config() -> TpuConfig:
    try:
        kind = jax.devices()[0].device_kind.lower()
    except Exception:
        kind = ""
    if "v5e" in kind or "v5 lite" in kind or "v5lite" in kind:
        # 128x128 MXU, 128 MiB VMEM, no bf16 VPU/EUP -> keep activation f32.
        return TpuConfig("v5e", 128, 1024, 100 * _MiB, 88 * _MiB, 1, jnp.float32)
    if "v6" in kind:
        # 256x256 MXU, 128 MiB VMEM, bf16 VPU/EUP.
        return TpuConfig("v6e", 256, 1024, 100 * _MiB, 88 * _MiB, 1, jnp.bfloat16)
    if "v7" in kind:
        # 2 TCs/chip, 64 MiB VMEM per TC, 256x256 MXU.
        return TpuConfig("v7x", 256, 512, 48 * _MiB, 40 * _MiB, 2, jnp.bfloat16)
    if "v5" in kind:  # v5p
        return TpuConfig("v5p", 128, 1024, 100 * _MiB, 88 * _MiB, 1, jnp.float32)
    # Unknown / older chip: stay inside the default scoped VMEM limit.
    return TpuConfig(kind or "unknown", 128, 256, None, 12 * _MiB, 1, jnp.float32)


# ----------------------------------------------------------------------------
# Kernels
# ----------------------------------------------------------------------------
def _resident_kernel(act_dtype, x_ref, w1_ref, b1_ref, w2_ref, b2_ref, o_ref):
    # fc1 on the MXU (bf16 operands, f32 accumulation) + f32 bias.
    h = jnp.dot(x_ref[...], w1_ref[...], preferred_element_type=jnp.float32)
    h = (h + b1_ref[...]).astype(act_dtype)
    # sigmoid(h) = 0.5 * tanh(0.5 * h) + 0.5  -> EUP tanh + cheap VPU fma.
    h = 0.5 * jnp.tanh(0.5 * h) + 0.5
    out = jnp.dot(h.astype(w2_ref.dtype), w2_ref[...],
                  preferred_element_type=jnp.float32)
    o_ref[...] = (out + b2_ref[...]).astype(o_ref.dtype)


def _htiled_kernel(act_dtype, x_ref, w1_ref, b1_ref, w2_ref, b2_ref, o_ref,
                   acc_ref):
    # Hidden dim tiled across grid axis 1 (reduction); acc holds fc2 partials.
    j = pl.program_id(1)
    h = jnp.dot(x_ref[...], w1_ref[...], preferred_element_type=jnp.float32)
    h = (h + b1_ref[...]).astype(act_dtype)
    h = 0.5 * jnp.tanh(0.5 * h) + 0.5
    part = jnp.dot(h.astype(w2_ref.dtype), w2_ref[...],
                   preferred_element_type=jnp.float32)

    @pl.when(j == 0)
    def _init():
        acc_ref[...] = jnp.zeros_like(acc_ref)

    acc_ref[...] += part

    @pl.when(j == pl.num_programs(1) - 1)
    def _finalize():
        o_ref[...] = (acc_ref[...] + b2_ref[...]).astype(o_ref.dtype)


# ----------------------------------------------------------------------------
# Planning
# ----------------------------------------------------------------------------
def _plan_features(In, H, Out, cfg, matmul_dtype, out_dtype):
    lane = cfg.lane_align
    InP = _round_up(In, lane)
    OutP = _round_up(Out, lane)
    HP0 = _round_up(H, lane)
    wt = np.dtype(matmul_dtype).itemsize
    ob = np.dtype(out_dtype).itemsize

    def est_bytes(TB, TH, nh):
        # Weights: single-buffered when fully resident (nh == 1), else double.
        w_bufs = 1 if nh == 1 else 2
        w = (InP * TH + TH * OutP) * wt * w_bufs + TH * 4 * w_bufs + OutP * 4
        x_tile = TB * InP * wt * 2          # double-buffered input tile
        o_tile = TB * OutP * ob * 2         # double-buffered output tile
        acc = 0 if nh == 1 else TB * OutP * 4
        h_tmp = TB * TH * 4                 # f32 fc1 activation working set
        return w + x_tile + o_tile + acc + h_tmp

    # Shrink the hidden tile until the weights (+ a minimal batch tile) fit.
    TH = HP0
    while TH > lane and est_bytes(8, TH, _cdiv(HP0, TH)) > cfg.vmem_budget:
        TH = _round_up(TH // 2, lane)
    nh = _cdiv(HP0, TH)
    HP = nh * TH
    # TODO(synk): if even TH == lane does not fit (enormous In/Out), the In/Out
    # dims would also need grid tiling; not needed for FFNN-sized layers.

    # Largest batch tile (multiple of 8, <= tb_max) that fits the budget.
    tb_cap = max(8, (cfg.tb_max // 8) * 8)
    while tb_cap > 8 and est_bytes(tb_cap, TH, nh) > cfg.vmem_budget:
        tb_cap = max(8, ((tb_cap // 2) // 8) * 8)
    return InP, HP, OutP, TH, nh, tb_cap


def _plan_batch(B, tb_cap, cfg):
    BP = _round_up(B, 8)               # pad batch only to the sublane multiple
    num_b = _cdiv(BP, tb_cap)
    if cfg.num_cores > 1 and num_b == 1 and BP >= 16:
        num_b = cfg.num_cores          # keep both v7x TensorCores busy
    TB = _round_up(_cdiv(BP, num_b), 8)   # near-even split, waste < 8 rows/tile
    BP = TB * num_b
    return TB, num_b, BP


# ----------------------------------------------------------------------------
# Parameter preparation (done once, not per call)
# ----------------------------------------------------------------------------
@dataclass(frozen=True)
class PreparedFFNN:
    w1: jax.Array       # (InP, HP)  matmul dtype, zero-padded
    b1: jax.Array       # (1, HP)    f32, zero-padded
    w2: jax.Array       # (HP, OutP) matmul dtype, zero-padded
    b2: jax.Array       # (1, OutP)  f32, zero-padded
    in_features: int
    hidden_features: int
    out_features: int
    InP: int
    HP: int
    OutP: int
    TH: int
    nh: int
    tb_cap: int
    matmul_dtype: Any
    out_dtype: Any
    cfg: TpuConfig


def prepare_ffnn_params(w1_t, b1, w2_t, b2, *, cfg=None,
                        matmul_dtype=jnp.bfloat16, out_dtype=jnp.bfloat16):
    """Pad + cast the FFNN parameters once (hoisted out of the per-call path).

    w1_t: [In, H]  (fc1 weight pre-transposed to [in_features, out_features])
    b1:   [1, H] or [H]
    w2_t: [H, Out]
    b2:   [1, Out] or [Out]

    The zero padding added here is what makes padded K rows / hidden units
    mathematically inert (sigmoid(0)=0.5 is cancelled by zero W2 rows).  Do
    NOT pass weights that were already padded with non-zero garbage.
    """
    cfg = cfg or detect_tpu_config()
    In, H = w1_t.shape
    H2, Out = w2_t.shape
    assert H2 == H, "fc1/fc2 hidden sizes disagree"
    b1 = jnp.reshape(b1, (1, H)).astype(jnp.float32)
    b2 = jnp.reshape(b2, (1, Out)).astype(jnp.float32)

    InP, HP, OutP, TH, nh, tb_cap = _plan_features(
        In, H, Out, cfg, matmul_dtype, out_dtype)

    def pad2(a, rows, cols):
        return jnp.pad(a, ((0, rows - a.shape[0]), (0, cols - a.shape[1])))

    w1_p = pad2(w1_t, InP, HP).astype(matmul_dtype)
    w2_p = pad2(w2_t, HP, OutP).astype(matmul_dtype)
    b1_p = pad2(b1, 1, HP)
    b2_p = pad2(b2, 1, OutP)
    return PreparedFFNN(w1_p, b1_p, w2_p, b2_p, In, H, Out, InP, HP, OutP,
                        TH, nh, tb_cap, matmul_dtype, out_dtype, cfg)


# ----------------------------------------------------------------------------
# Forward
# ----------------------------------------------------------------------------
def ffnn_forward(x, prepared: PreparedFFNN):
    """x: [B, In] (any float dtype; ideally already in prepared.matmul_dtype)."""
    p = prepared
    cfg = p.cfg
    B, In = x.shape
    if In != p.in_features:
        raise ValueError(f"expected input features {p.in_features}, got {In}")

    TB, num_b, BP = _plan_batch(B, p.tb_cap, cfg)

    if x.dtype != p.matmul_dtype:
        x = x.astype(p.matmul_dtype)
    if (BP, p.InP) != (B, In):
        x_p = jnp.pad(x, ((0, BP - B), (0, p.InP - In)))
    else:
        x_p = x

    wt_bytes = np.dtype(p.matmul_dtype).itemsize
    out_bytes = np.dtype(p.out_dtype).itemsize
    cost = pl.CostEstimate(
        flops=2 * B * (p.in_features * p.hidden_features
                       + p.hidden_features * p.out_features),
        transcendentals=B * p.hidden_features,
        bytes_accessed=(x_p.size * wt_bytes
                        + p.w1.size * wt_bytes
                        + p.w2.size * wt_bytes
                        + BP * p.OutP * out_bytes),
    )

    cp_kwargs = {}
    if cfg.vmem_limit_bytes is not None:
        cp_kwargs["vmem_limit_bytes"] = cfg.vmem_limit_bytes

    def call(single_buffer: bool):
        resident_mode = {"pipeline_mode": pl.Buffered(1)} if single_buffer else {}
        if p.nh == 1:
            # Fully weight-resident path: 1-D batch grid.
            grid = (num_b,)
            in_specs = [
                pl.BlockSpec((TB, p.InP), lambda i: (i, 0)),                    # x
                pl.BlockSpec((p.InP, p.HP), lambda i: (0, 0), **resident_mode),  # W1
                pl.BlockSpec((1, p.HP), lambda i: (0, 0), **resident_mode),      # b1
                pl.BlockSpec((p.HP, p.OutP), lambda i: (0, 0), **resident_mode),  # W2
                pl.BlockSpec((1, p.OutP), lambda i: (0, 0), **resident_mode),     # b2
            ]
            out_specs = pl.BlockSpec((TB, p.OutP), lambda i: (i, 0))
            kernel = functools.partial(_resident_kernel, cfg.act_dtype)
            scratch_shapes = ()
            dim_sem = ("parallel",)
        else:
            # Hidden-dim-tiled fallback (weights too big for resident VMEM).
            grid = (num_b, p.nh)
            in_specs = [
                pl.BlockSpec((TB, p.InP), lambda i, j: (i, 0)),
                pl.BlockSpec((p.InP, p.TH), lambda i, j: (0, j)),
                pl.BlockSpec((1, p.TH), lambda i, j: (0, j)),
                pl.BlockSpec((p.TH, p.OutP), lambda i, j: (j, 0)),
                pl.BlockSpec((1, p.OutP), lambda i, j: (0, 0), **resident_mode),
            ]
            out_specs = pl.BlockSpec((TB, p.OutP), lambda i, j: (i, 0))
            kernel = functools.partial(_htiled_kernel, cfg.act_dtype)
            scratch_shapes = [pltpu.VMEM((TB, p.OutP), jnp.float32)]
            dim_sem = ("parallel", "arbitrary")

        return pl.pallas_call(
            kernel,
            out_shape=jax.ShapeDtypeStruct((BP, p.OutP), p.out_dtype),
            grid=grid,
            in_specs=in_specs,
            out_specs=out_specs,
            scratch_shapes=scratch_shapes,
            compiler_params=pltpu.CompilerParams(
                dimension_semantics=dim_sem, **cp_kwargs),
            cost_estimate=cost,
        )(x_p, p.w1, p.b1, p.w2, p.b2)

    try:
        out_p = call(single_buffer=True)
    except Exception:
        # pl.Buffered(1) not supported by this JAX/Mosaic build -> fall back
        # to default double-buffered resident weights (correctness identical).
        out_p = call(single_buffer=False)

    return out_p[:B, :p.out_features]


def reference_forward(x, w1_t, b1, w2_t, b2):
    h = jax.nn.sigmoid(
        jnp.dot(x, w1_t, preferred_element_type=jnp.float32) + b1)
    return jnp.dot(h.astype(w2_t.dtype), w2_t,
                   preferred_element_type=jnp.float32) + b2


if __name__ == "__main__":
    # Small shapes consistent with FFNN(input_size, hidden_size, output_size).
    batch, input_size, hidden_size, output_size = 8, 16, 32, 8

    key = jax.random.PRNGKey(0)
    kx, k1, kb1, k2, kb2 = jax.random.split(key, 5)

    # Deterministic PyTorch-Linear-style uniform init, stored pre-transposed
    # as [in_features, out_features].
    bound1 = 1.0 / (input_size ** 0.5)
    bound2 = 1.0 / (hidden_size ** 0.5)
    w1_t = jax.random.uniform(k1, (input_size, hidden_size), jnp.float32, -bound1, bound1)
    b1 = jax.random.uniform(kb1, (1, hidden_size), jnp.float32, -bound1, bound1)
    w2_t = jax.random.uniform(k2, (hidden_size, output_size), jnp.float32, -bound2, bound2)
    b2 = jax.random.uniform(kb2, (1, output_size), jnp.float32, -bound2, bound2)

    x = jax.random.normal(kx, (batch, input_size), jnp.float32)

    # One-time parameter preparation (padding + bf16 cast hoisted out of the
    # per-call path).
    params = prepare_ffnn_params(w1_t, b1, w2_t, b2)

    out = ffnn_forward(x, params)
    out = jax.block_until_ready(out)
    assert out.shape == (batch, output_size)
    out32 = out.astype(jnp.float32)

    # Check against a reference using the same bf16 matmul operands / f32
    # accumulation (matches the kernel's numerics up to bf16 activation/output
    # rounding).
    ref_bf16 = reference_forward(x.astype(jnp.bfloat16),
                                 w1_t.astype(jnp.bfloat16), b1,
                                 w2_t.astype(jnp.bfloat16), b2)
    assert jnp.allclose(out32, ref_bf16, atol=1.5e-2, rtol=1.5e-2), (
        float(jnp.max(jnp.abs(out32 - ref_bf16))))

    # Loose sanity check against the pure-f32 reference (bf16 rounding only).
    ref_f32 = reference_forward(x, w1_t, b1, w2_t, b2)
    assert jnp.allclose(out32, ref_f32, atol=5e-2, rtol=5e-2)

    print("KERNEL_OK")
</pallas_src>

<mosaic_0001>
module attributes {stable_mosaic.version = 11 : i64} {
  func.func @_resident_kernel(%arg0: i32, %arg1: memref<8x128xbf16, #tpu.memory_space<vmem>>, %arg2: memref<128x128xbf16, #tpu.memory_space<vmem>>, %arg3: memref<1x128xf32, #tpu.memory_space<vmem>>, %arg4: memref<128x128xbf16, #tpu.memory_space<vmem>>, %arg5: memref<1x128xf32, #tpu.memory_space<vmem>>, %arg6: memref<8x128xbf16, #tpu.memory_space<vmem>>) attributes {dimension_semantics = [#tpu.dimension_semantics<parallel>], iteration_bounds = array<i64: 1>, scalar_prefetch = 0 : i64, scratch_operands = 0 : i64, tpu.core_type = #tpu.core_type<tc>, window_params = [{transform_indices = @transform_0, window_bounds = array<i64: 8, 128>}, {pipeline_mode = #tpu.pipeline_mode<synchronous>, transform_indices = @transform_1, window_bounds = array<i64: 128, 128>}, {pipeline_mode = #tpu.pipeline_mode<synchronous>, transform_indices = @transform_2, window_bounds = array<i64: 1, 128>}, {pipeline_mode = #tpu.pipeline_mode<synchronous>, transform_indices = @transform_3, window_bounds = array<i64: 128, 128>}, {pipeline_mode = #tpu.pipeline_mode<synchronous>, transform_indices = @transform_4, window_bounds = array<i64: 1, 128>}, {transform_indices = @transform_5, window_bounds = array<i64: 8, 128>}]} {
    %c0 = arith.constant 0 : index
    %c0_0 = arith.constant 0 : index
    %0 = vector.load %arg1[%c0, %c0_0] : memref<8x128xbf16, #tpu.memory_space<vmem>>, vector<8x128xbf16>
    %c0_1 = arith.constant 0 : index
    %c0_2 = arith.constant 0 : index
    %1 = vector.load %arg2[%c0_1, %c0_2] : memref<128x128xbf16, #tpu.memory_space<vmem>>, vector<128x128xbf16>
    %cst = arith.constant dense<0.000000e+00> : vector<8x128xf32>
    %2 = tpu.matmul %0, %1, %cst {dimension_numbers = #tpu.dot_dimension_numbers<[1], [0], [0], [1], [0, 0, 1, 1], [], []>} : vector<8x128xbf16>, vector<128x128xbf16>, vector<8x128xf32> -> vector<8x128xf32>
    %c0_3 = arith.constant 0 : index
    %c0_4 = arith.constant 0 : index
    %3 = vector.load %arg3[%c0_3, %c0_4] : memref<1x128xf32, #tpu.memory_space<vmem>>, vector<1x128xf32>
    %4 = vector.broadcast %3 : vector<1x128xf32> to vector<8x128xf32>
    %5 = arith.addf %2, %4 : vector<8x128xf32>
    %cst_5 = arith.constant 5.000000e-01 : f32
    %6 = vector.broadcast %cst_5 : f32 to vector<8x128xf32>
    %7 = arith.mulf %6, %5 : vector<8x128xf32>
    %8 = math.tanh %7 : vector<8x128xf32>
    %cst_6 = arith.constant 5.000000e-01 : f32
    %9 = vector.broadcast %cst_6 : f32 to vector<8x128xf32>
    %10 = arith.mulf %9, %8 : vector<8x128xf32>
    %cst_7 = arith.constant 5.000000e-01 : f32
    %11 = vector.broadcast %cst_7 : f32 to vector<8x128xf32>
    %12 = arith.addf %10, %11 : vector<8x128xf32>
    %13 = arith.truncf %12 : vector<8x128xf32> to vector<8x128xbf16>
    %c0_8 = arith.constant 0 : index
    %c0_9 = arith.constant 0 : index
    %14 = vector.load %arg4[%c0_8, %c0_9] : memref<128x128xbf16, #tpu.memory_space<vmem>>, vector<128x128xbf16>
    %cst_10 = arith.constant dense<0.000000e+00> : vector<8x128xf32>
    %15 = tpu.matmul %13, %14, %cst_10 {dimension_numbers = #tpu.dot_dimension_numbers<[1], [0], [0], [1], [0, 0, 1, 1], [], []>} : vector<8x128xbf16>, vector<128x128xbf16>, vector<8x128xf32> -> vector<8x128xf32>
    %c0_11 = arith.constant 0 : index
    %c0_12 = arith.constant 0 : index
    %16 = vector.load %arg5[%c0_11, %c0_12] : memref<1x128xf32, #tpu.memory_space<vmem>>, vector<1x128xf32>
    %17 = vector.broadcast %16 : vector<1x128xf32> to vector<8x128xf32>
    %18 = arith.addf %15, %17 : vector<8x128xf32>
    %19 = arith.truncf %18 : vector<8x128xf32> to vector<8x128xbf16>
    %c0_13 = arith.constant 0 : index
    %c0_14 = arith.constant 0 : index
    %20 = vector.load %arg6[%c0_13, %c0_14] : memref<8x128xbf16, #tpu.memory_space<vmem>>, vector<8x128xbf16>
    tpu.vector_store %arg6[%c0_13, %c0_14], %19 {strides = array<i32>} : memref<8x128xbf16, #tpu.memory_space<vmem>>, vector<8x128xbf16>,
    return
  }
  func.func @transform_0(%arg0: i32) -> (i32, i32) {
    %c0_i32 = arith.constant 0 : i32
    %c0_i32_0 = arith.constant 0 : i32
    return %arg0, %c0_i32 : i32, i32
  }
  func.func @transform_1(%arg0: i32) -> (i32, i32) {
    %c0_i32 = arith.constant 0 : i32
    %c0_i32_0 = arith.constant 0 : i32
    %c0_i32_1 = arith.constant 0 : i32
    return %c0_i32, %c0_i32_0 : i32, i32
  }
  func.func @transform_2(%arg0: i32) -> (i32, i32) {
    %c0_i32 = arith.constant 0 : i32
    %c0_i32_0 = arith.constant 0 : i32
    %c0_i32_1 = arith.constant 0 : i32
    return %c0_i32, %c0_i32_0 : i32, i32
  }
  func.func @transform_3(%arg0: i32) -> (i32, i32) {
    %c0_i32 = arith.constant 0 : i32
    %c0_i32_0 = arith.constant 0 : i32
    %c0_i32_1 = arith.constant 0 : i32
    return %c0_i32, %c0_i32_0 : i32, i32
  }
  func.func @transform_4(%arg0: i32) -> (i32, i32) {
    %c0_i32 = arith.constant 0 : i32
    %c0_i32_0 = arith.constant 0 : i32
    %c0_i32_1 = arith.constant 0 : i32
    return %c0_i32, %c0_i32_0 : i32, i32
  }
  func.func @transform_5(%arg0: i32) -> (i32, i32) {
    %c0_i32 = arith.constant 0 : i32
    %c0_i32_0 = arith.constant 0 : i32
    return %arg0, %c0_i32 : i32, i32
  }
}

module attributes {stable_mosaic.version = 11 : i64} {
  func.func @_resident_kernel(%arg0: i32, %arg1: memref<8x128xbf16, #tpu.memory_space<vmem>>, %arg2: memref<128x128xbf16, #tpu.memory_space<vmem>>, %arg3: memref<1x128xf32, #tpu.memory_space<vmem>>, %arg4: memref<128x128xbf16, #tpu.memory_space<vmem>>, %arg5: memref<1x128xf32, #tpu.memory_space<vmem>>, %arg6: memref<8x128xbf16, #tpu.memory_space<vmem>>) attributes {dimension_semantics = [#tpu.dimension_semantics<parallel>], iteration_bounds = array<i64: 1>, scalar_prefetch = 0 : i64, scratch_operands = 0 : i64, tpu.core_type = #tpu.core_type<tc>, window_params = [{transform_indices = @transform_0, window_bounds = array<i64: 8, 128>}, {pipeline_mode = #tpu.pipeline_mode<synchronous>, transform_indices = @transform_1, window_bounds = array<i64: 128, 128>}, {pipeline_mode = #tpu.pipeline_mode<synchronous>, transform_indices = @transform_2, window_bounds = array<i64: 1, 128>}, {pipeline_mode = #tpu.pipeline_mode<synchronous>, transform_indices = @transform_3, window_bounds = array<i64: 128, 128>}, {pipeline_mode = #tpu.pipeline_mode<synchronous>, transform_indices = @transform_4, window_bounds = array<i64: 1, 128>}, {transform_indices = @transform_5, window_bounds = array<i64: 8, 128>}]} {
    %c0 = arith.constant 0 : index
    %c0_0 = arith.constant 0 : index
    %0 = vector.load %arg1[%c0, %c0_0] : memref<8x128xbf16, #tpu.memory_space<vmem>>, vector<8x128xbf16>
    %c0_1 = arith.constant 0 : index
    %c0_2 = arith.constant 0 : index
    %1 = vector.load %arg2[%c0_1, %c0_2] : memref<128x128xbf16, #tpu.memory_space<vmem>>, vector<128x128xbf16>
    %cst = arith.constant dense<0.000000e+00> : vector<8x128xf32>
    %2 = tpu.matmul %0, %1, %cst {dimension_numbers = #tpu.dot_dimension_numbers<[1], [0], [0], [1], [0, 0, 1, 1], [], []>} : vector<8x128xbf16>, vector<128x128xbf16>, vector<8x128xf32> -> vector<8x128xf32>
    %c0_3 = arith.constant 0 : index
    %c0_4 = arith.constant 0 : index
    %3 = vector.load %arg3[%c0_3, %c0_4] : memref<1x128xf32, #tpu.memory_space<vmem>>, vector<1x128xf32>
    %4 = vector.broadcast %3 : vector<1x128xf32> to vector<8x128xf32>
    %5 = arith.addf %2, %4 : vector<8x128xf32>
    %cst_5 = arith.constant 5.000000e-01 : f32
    %6 = vector.broadcast %cst_5 : f32 to vector<8x128xf32>
    %7 = arith.mulf %6, %5 : vector<8x128xf32>
    %8 = math.tanh %7 : vector<8x128xf32>
    %cst_6 = arith.constant 5.000000e-01 : f32
    %9 = vector.broadcast %cst_6 : f32 to vector<8x128xf32>
    %10 = arith.mulf %9, %8 : vector<8x128xf32>
    %cst_7 = arith.constant 5.000000e-01 : f32
    %11 = vector.broadcast %cst_7 : f32 to vector<8x128xf32>
    %12 = arith.addf %10, %11 : vector<8x128xf32>
    %13 = arith.truncf %12 : vector<8x128xf32> to vector<8x128xbf16>
    %c0_8 = arith.constant 0 : index
    %c0_9 = arith.constant 0 : index
    %14 = vector.load %arg4[%c0_8, %c0_9] : memref<128x128xbf16, #tpu.memory_space<vmem>>, vector<128x128xbf16>
    %cst_10 = arith.constant dense<0.000000e+00> : vector<8x128xf32>
    %15 = tpu.matmul %13, %14, %cst_10 {dimension_numbers = #tpu.dot_dimension_numbers<[1], [0], [0], [1], [0, 0, 1, 1], [], []>} : vector<8x128xbf16>, vector<128x128xbf16>, vector<8x128xf32> -> vector<8x128xf32>
    %c0_11 = arith.constant 0 : index
    %c0_12 = arith.constant 0 : index
    %16 = vector.load %arg5[%c0_11, %c0_12] : memref<1x128xf32, #tpu.memory_space<vmem>>, vector<1x128xf32>
    %17 = vector.broadcast %16 : vector<1x128xf32> to vector<8x128xf32>
    %18 = arith.addf %15, %17 : vector<8x128xf32>
    %19 = arith.truncf %18 : vector<8x128xf32> to vector<8x128xbf16>
    %c0_13 = arith.constant 0 : index
    %c0_14 = arith.constant 0 : index
    %20 = vector.load %arg6[%c0_13, %c0_14] : memref<8x128xbf16, #tpu.memory_space<vmem>>, vector<8x128xbf16>
    tpu.vector_store %arg6[%c0_13, %c0_14], %19 {strides = array<i32>} : memref<8x128xbf16, #tpu.memory_space<vmem>>, vector<8x128xbf16>,
    return
  }
  func.func @transform_0(%arg0: i32) -> (i32, i32) {
    %c0_i32 = arith.constant 0 : i32
    %c0_i32_0 = arith.constant 0 : i32
    return %arg0, %c0_i32 : i32, i32
  }
  func.func @transform_1(%arg0: i32) -> (i32, i32) {
    %c0_i32 = arith.constant 0 : i32
    %c0_i32_0 = arith.constant 0 : i32
    %c0_i32_1 = arith.constant 0 : i32
    return %c0_i32, %c0_i32_0 : i32, i32
  }
  func.func @transform_2(%arg0: i32) -> (i32, i32) {
    %c0_i32 = arith.constant 0 : i32
    %c0_i32_0 = arith.constant 0 : i32
    %c0_i32_1 = arith.constant 0 : i32
    return %c0_i32, %c0_i32_0 : i32, i32
  }
  func.func @transform_3(%arg0: i32) -> (i32, i32) {
    %c0_i32 = arith.constant 0 : i32
    %c0_i32_0 = arith.constant 0 : i32
    %c0_i32_1 = arith.constant 0 : i32
    return %c0_i32, %c0_i32_0 : i32, i32
  }
  func.func @transform_4(%arg0: i32) -> (i32, i32) {
    %c0_i32 = arith.constant 0 : i32
    %c0_i32_0 = arith.constant 0 : i32
    %c0_i32_1 = arith.constant 0 : i32
    return %c0_i32, %c0_i32_0 : i32, i32
  }
  func.func @transform_5(%arg0: i32) -> (i32, i32) {
    %c0_i32 = arith.constant 0 : i32
    %c0_i32_0 = arith.constant 0 : i32
    return %arg0, %c0_i32 : i32, i32
  }
}

</mosaic_0001>

<bundles_post_ra>
// kernel: tpu_custom_call.1
= control target key start
LH: loop header
LB: loop body
LE: loop exit
PB: predicated region body
PF: predicated region fallthrough
CT: control target
= control target key end

     0   :  { %10 = vsyncpa [#allocation3], 0  ;;  %s601_s0 = inlined_call_operand.hbm [shape: bf16[8,128], index: 0, kind: input, shape index: {}]   ;;  %s602_s1 = inlined_call_operand.hbm [shape: bf16[128,128], index: 1, kind: input, shape index: {}]   ;;  %s603_s2 = inlined_call_operand.vmem [shape: f32[1,128], index: 2, kind: input, shape index: {}]   ;;  %s604_s3 = inlined_call_operand.hbm [shape: bf16[128,128], index: 3, kind: input, shape index: {}]   ;;  %s605_s4 = inlined_call_operand.vmem [shape: f32[1,128], index: 4, kind: input, shape index: {}]   ;;  %s606_s5 = inlined_call_operand.hbm [shape: bf16[8,128], index: 5, kind: output, shape index: {}]  }
   0x1   :  { %11 = vsyncpa [#allocation6], 0 }
   0x2   :  { %12 = vsyncpa [#allocation4], 0  ;;  %s503_s18 = smov [#allocation5]   ;;  %s409_s22 = scalar_lea.hbm %s602_s1, 1024 }
   0x3   :  { %s28_s19 = sshll.u32 %s503_s18, 4  ;;  %p410_p0 = scmp.ne.s32.totalorder %s602_s1, %s409_s22  ;;  %s29_s19 = int_to_ptr.vmem [resolvable:$true] %s28_s19 }
   0x4   :  { %p413_p1 = scmp.lt.u32.totalorder %s409_s22, %s602_s1 }
   0x6   :  { %p415_p2 = pnand %p413_p1, %p410_p0 }
   0x8   :  { %418 = shalt.err (!%p415_p2)
}
   0x9   :  { %s419_s27 = scalar_lea.vmem %s29_s19, 1024  ;;  %p424_p4 = scmp.lt.s32.totalorder %s29_s19, %s29_s19 }
   0xa   :  { %p420_p3 = scmp.ne.s32.totalorder %s29_s19, %s419_s27  ;;  %p425_p5 = scmp.lt.s32.totalorder %s419_s27, %s419_s27 }
   0xc   :  { %p426_p6 = por %p425_p5, %p424_p4 }
   0xe   :  { %p427_p7 = pnand %p426_p6, %p420_p3 }
  0x10   :  { %430 = shalt.err (!%p427_p7)
}
  0x11   :  { %s504_s28 = smov 64   ;;  %s505_s29 = smov 4  }
  0x12   :  { %34 = dma.hbm_to_vmem [thread:$0]  %s602_s1, 1024, %s29_s19, [#allocation6], %s504_s28, %s504_s28, %s505_s29  }
  0x13   :  { %s506_s7 = smov [#allocation2]   ;;  %s507_s9 = smov [#allocation7]  }
  0x14   :  { %s19_s8 = sshll.u32 %s506_s7, 4  ;;  %s42_s10 = sshll.u32 %s507_s9, 4  ;;  %s20_s8 = int_to_ptr.vmem [resolvable:$true] %s19_s8  ;;  %s43_s10 = int_to_ptr.vmem [resolvable:$true] %s42_s10 }
  0x15   :  { %s431_s13 = scalar_lea.hbm %s601_s0, 64 }
  0x16   :  { %p432_p8 = scmp.ne.s32.totalorder %s601_s0, %s431_s13  ;;  %p435_p9 = scmp.lt.u32.totalorder %s431_s13, %s601_s0 }
  0x18   :  { %p437_p10 = pnand %p435_p9, %p432_p8 }
  0x1a   :  { %440 = shalt.err (!%p437_p10)
}
  0x1b   :  { %s441_s1 = scalar_lea.vmem %s20_s8, 64  ;;  %p446_p12 = scmp.lt.s32.totalorder %s20_s8, %s20_s8 }
  0x1c   :  { %p442_p11 = scmp.ne.s32.totalorder %s20_s8, %s441_s1  ;;  %p447_p13 = scmp.lt.s32.totalorder %s441_s1, %s441_s1 }
  0x1e   :  { %p448_p0 = por %p447_p13, %p446_p12 }
  0x20   :  { %p449_p1 = pnand %p448_p0, %p442_p11 }
  0x22   :  { %452 = shalt.err (!%p449_p1)
}
  0x23   :  { %22 = dma.hbm_to_vmem [thread:$0]  %s601_s0, 64, %s20_s8, [#allocation3]  }
  0x24   :  { %s453_s22 = scalar_lea.hbm %s604_s3, 1024 }
  0x25   :  { %p454_p2 = scmp.ne.s32.totalorder %s604_s3, %s453_s22  ;;  %p457_p3 = scmp.lt.u32.totalorder %s453_s22, %s604_s3 }
  0x27   :  { %p459_p4 = pnand %p457_p3, %p454_p2 }
  0x29   :  { %462 = shalt.err (!%p459_p4)
}
  0x2a   :  { %s463_s27 = scalar_lea.vmem %s43_s10, 1024  ;;  %p468_p6 = scmp.lt.s32.totalorder %s43_s10, %s43_s10 }
  0x2b   :  { %p464_p5 = scmp.ne.s32.totalorder %s43_s10, %s463_s27  ;;  %p469_p7 = scmp.lt.s32.totalorder %s463_s27, %s463_s27 }
  0x2d   :  { %p470_p8 = por %p469_p7, %p468_p6 }
  0x2f   :  { %p471_p9 = pnand %p470_p8, %p464_p5 }
  0x31   :  { %474 = shalt.err (!%p471_p9)
}
  0x32   :  { %48 = dma.hbm_to_vmem [thread:$0]  %s604_s3, 1024, %s43_s10, [#allocation6], %s504_s28, %s504_s28, %s505_s29  }
  0x33   :  { %497 = dma.done.wait [#allocation3], 64  }
  0x34   :  { %498 = vsyncadd [#allocation3], 4294967232 }
  0x35   :  { %499 = dma.done.wait [#allocation6], 2048  }
  0x36   :  { %500 = vsyncadd [#allocation6], 4294965248  ;;  %v508_v0 = vmov 0.0   ;;  %vm509_vm0 = vmmov 0   ;;  %v391_v1 = vld [vmem:[#allocation5] sm:$0xff]   ;;  %v392_v2 = vld [vmem:[#allocation5 + $0x8] sm:$0xff]  }
  0x37   :  { %343 = vmatprep.subr.bf16.mxu0 %v508_v0  ;;  %359 = vmatprep.mubr.msk.bf16.mxu0 %vm509_vm0, %v508_v0  ;;  %v393_v3 = vld [vmem:[#allocation5 + $0x10] sm:$0xff]   ;;  %v399_v4 = vld [vmem:[#allocation7] sm:$0xff]   ;;  %v394_v5 = vld [vmem:[#allocation5 + $0x18] sm:$0xff]   ;;  %s510_s7 = smov [#allocation8]  }
  0x38   :  { %363 = vmatprep.subr.bf16.mxu1 %v508_v0  ;;  %379 = vmatprep.mubr.msk.bf16.mxu1 %vm509_vm0, %v508_v0  ;;  %v400_v6 = vld [vmem:[#allocation7 + $0x8] sm:$0xff]   ;;  %v395_v7 = vld [vmem:[#allocation5 + $0x20] sm:$0xff]   ;;  %v401_v8 = vld [vmem:[#allocation7 + $0x10] sm:$0xff]   ;;  %s297_s8 = sshll.u32 %s510_s7, 4  ;;  %s298_s8 = int_to_ptr.vmem [resolvable:$true] %s297_s8 }
  0x39   :  { %344 = vmatpush3.bf16.msra.mxu0 %v391_v1  ;;  %364 = vmatpush3.bf16.msra.mxu1 %v399_v4  ;;  %v396_v9 = vld [vmem:[#allocation5 + $0x28] sm:$0xff]   ;;  %v397_v10 = vld [vmem:[#allocation5 + $0x30] sm:$0xff]   ;;  %v398_v11 = vld [vmem:[#allocation5 + $0x38] sm:$0xff]   ;;  %p480_p11 = scmp.lt.s32.totalorder %s298_s8, %s298_s8 }
  0x3a   :  { %345 = vmatprep.subr.bf16.mxu0 %v508_v0  ;;  %365 = vmatprep.subr.bf16.mxu1 %v508_v0  ;;  %v61_v12 = vld [vmem:[#allocation2] sm:$0xf]  ;;  %v403_v14 = vld [vmem:[#allocation7 + $0x20] sm:$0xff]   ;;  %v404_v15 = vld [vmem:[#allocation7 + $0x28] sm:$0xff]  }
  0x3b   :  { %v402_v13 = vld [vmem:[#allocation7 + $0x18] sm:$0xff]   ;;  %v405_v16 = vld [vmem:[#allocation7 + $0x30] sm:$0xff]  }
  0x3c   :  { %v406_v17 = vld [vmem:[#allocation7 + $0x38] sm:$0xff]  }
  0x3d   :  { %346 = vmatpush3.bf16.msra.mxu0 %v392_v2  ;;  %366 = vmatpush3.bf16.msra.mxu1 %v400_v6  ;;  %v307_v18 = vld [vmem:[%s603_s2] ss:$0 sm:$0xff]  ;;  %s475_s2 = scalar_lea.vmem %s298_s8, 64 }
  0x3e   :  { %347 = vmatprep.subr.bf16.mxu0 %v508_v0  ;;  %367 = vmatprep.subr.bf16.mxu1 %v508_v0  ;;  %v316_v29 = vld [vmem:[%s605_s4] ss:$0 sm:$0xff]  ;;  %p476_p10 = scmp.ne.s32.totalorder %s298_s8, %s475_s2  ;;  %p481_p12 = scmp.lt.s32.totalorder %s475_s2, %s475_s2 }
  0x40   :  { %p482_p13 = por %p481_p12, %p480_p11 }
  0x41   :  { %348 = vmatpush3.bf16.msra.mxu0 %v393_v3  ;;  %368 = vmatpush3.bf16.msra.mxu1 %v401_v8 }
  0x42   :  { %349 = vmatprep.subr.bf16.mxu0 %v508_v0  ;;  %369 = vmatprep.subr.bf16.mxu1 %v508_v0  ;;  %p483_p0 = pnand %p482_p13, %p476_p10 }
  0x45   :  { %350 = vmatpush3.bf16.msra.mxu0 %v394_v5  ;;  %370 = vmatpush3.bf16.msra.mxu1 %v402_v13 }
  0x46   :  { %351 = vmatprep.subr.bf16.mxu0 %v508_v0  ;;  %371 = vmatprep.subr.bf16.mxu1 %v508_v0 }
  0x49   :  { %352 = vmatpush3.bf16.msra.mxu0 %v395_v7  ;;  %372 = vmatpush3.bf16.msra.mxu1 %v403_v14 }
  0x4a   :  { %353 = vmatprep.subr.bf16.mxu0 %v508_v0  ;;  %373 = vmatprep.subr.bf16.mxu1 %v508_v0 }
  0x4d   :  { %354 = vmatpush3.bf16.msra.mxu0 %v396_v9  ;;  %374 = vmatpush3.bf16.msra.mxu1 %v404_v15 }
  0x4e   :  { %355 = vmatprep.subr.bf16.mxu0 %v508_v0  ;;  %375 = vmatprep.subr.bf16.mxu1 %v508_v0 }
  0x51   :  { %356 = vmatpush3.bf16.msra.mxu0 %v397_v10  ;;  %376 = vmatpush3.bf16.msra.mxu1 %v405_v16 }
  0x52   :  { %357 = vmatprep.subr.bf16.mxu0 %v508_v0  ;;  %377 = vmatprep.subr.bf16.mxu1 %v508_v0 }
  0x55   :  { %358 = vmatpush3.bf16.msra.mxu0 %v398_v11  ;;  %378 = vmatpush3.bf16.msra.mxu1 %v406_v17 }
  0x58   :  { %360 = vmatmul.mubr.bf16.vlgmr.msra.gmra.mrb[0].mxu0 %v61_v12 }
 0x12b   :  { %v167_v19 = vpop.f32.mrb[0].mxu0 }
 0x12c   :  { %v168_v20 = vadd.f32 %v307_v18, %v167_v19  ;;  %v361_v21 = vpop.f32.mrb[1].mxu0 }
 0x12d   :  { %v170_v22 = vpop.f32.mrb[2].mxu0 }
 0x12e   :  { %v173_v23 = vmul.f32 0.5, %v168_v20  ;;  %v362_v24 = vpop.f32.mrb[3].mxu0 }
 0x130   :  { %407 = vtanh.f32 %v173_v23 }
 0x13a   :  { %v408_v25 = vpop.eup %407 }
 0x13b   :  { %v175_v26 = vmul.f32 0.5, %v408_v25 }
 0x13d   :  { %v176_v27 = vadd.f32 0.5, %v175_v26 }
 0x13f   :  { %v177_v28 = vpack.c.bf16 %v176_v27, %v176_v27 }
 0x141   :  { %380 = vmatmul.mubr.bf16.vlgmr.msra.gmra.mrb[0].mxu1 %v177_v28 }
 0x214   :  { %v283_v30 = vpop.f32.mrb[0].mxu1 }
 0x215   :  { %v284_v31 = vadd.f32 %v316_v29, %v283_v30  ;;  %v381_v32 = vpop.f32.mrb[1].mxu1 }
 0x216   :  { %v286_v33 = vpop.f32.mrb[2].mxu1 }
 0x217   :  { %v289_v34 = vpack.c.bf16 %v284_v31, %v284_v31  ;;  %v382_v35 = vpop.f32.mrb[3].mxu1 }
 0x219   :  { %290 = vst [vmem:[#allocation8] sm:$0xf] %v289_v34 }
 0x21a   :  { %486 = shalt.err (!%p483_p0)
}
 0x21b   :  { %s487_s4 = scalar_lea.hbm %s606_s5, 64 }
 0x21c   :  { %p488_p1 = scmp.ne.s32.totalorder %s606_s5, %s487_s4  ;;  %p491_p2 = scmp.lt.u32.totalorder %s487_s4, %s606_s5 }
 0x21e   :  { %p493_p3 = pnand %p491_p2, %p488_p1 }
 0x220   :  { %496 = shalt.err (!%p493_p3)
}
 0x221   :  { %300 = dma.vmem_to_hbm [thread:$0]  %s298_s8, 64, %s606_s5, [#allocation4]  }
 0x222   :  { %501 = dma.done.wait [#allocation4], 64  }
 0x223   :  { %502 = vsyncadd [#allocation4], 4294967232 }
 0x224   :  { %304 = vsyncpa [#allocation3], 1 }
 0x225   :  { %305 = vsyncpa [#allocation6], 1 }
 0x226   :  { %306 = vsyncpa [#allocation4], 1 }

// kernel: tpu_custom_call.1
= control target key start
LH: loop header
LB: loop body
LE: loop exit
PB: predicated region body
PF: predicated region fallthrough
CT: control target
= control target key end

     0   :  { %10 = vsyncpa [#allocation3], 0  ;;  %s601_s0 = inlined_call_operand.hbm [shape: bf16[8,128], index: 0, kind: input, shape index: {}]   ;;  %s602_s1 = inlined_call_operand.hbm [shape: bf16[128,128], index: 1, kind: input, shape index: {}]   ;;  %s603_s2 = inlined_call_operand.vmem [shape: f32[1,128], index: 2, kind: input, shape index: {}]   ;;  %s604_s3 = inlined_call_operand.hbm [shape: bf16[128,128], index: 3, kind: input, shape index: {}]   ;;  %s605_s4 = inlined_call_operand.vmem [shape: f32[1,128], index: 4, kind: input, shape index: {}]   ;;  %s606_s5 = inlined_call_operand.hbm [shape: bf16[8,128], index: 5, kind: output, shape index: {}]  }
   0x1   :  { %11 = vsyncpa [#allocation6], 0 }
   0x2   :  { %12 = vsyncpa [#allocation4], 0  ;;  %s503_s18 = smov [#allocation5]   ;;  %s409_s22 = scalar_lea.hbm %s602_s1, 1024 }
   0x3   :  { %s28_s19 = sshll.u32 %s503_s18, 4  ;;  %p410_p0 = scmp.ne.s32.totalorder %s602_s1, %s409_s22  ;;  %s29_s19 = int_to_ptr.vmem [resolvable:$true] %s28_s19 }
   0x4   :  { %p413_p1 = scmp.lt.u32.totalorder %s409_s22, %s602_s1 }
   0x6   :  { %p415_p2 = pnand %p413_p1, %p410_p0 }
   0x8   :  { %418 = shalt.err (!%p415_p2)
}
   0x9   :  { %s419_s27 = scalar_lea.vmem %s29_s19, 1024  ;;  %p424_p4 = scmp.lt.s32.totalorder %s29_s19, %s29_s19 }
   0xa   :  { %p420_p3 = scmp.ne.s32.totalorder %s29_s19, %s419_s27  ;;  %p425_p5 = scmp.lt.s32.totalorder %s419_s27, %s419_s27 }
   0xc   :  { %p426_p6 = por %p425_p5, %p424_p4 }
   0xe   :  { %p427_p7 = pnand %p426_p6, %p420_p3 }
  0x10   :  { %430 = shalt.err (!%p427_p7)
}
  0x11   :  { %s504_s28 = smov 64   ;;  %s505_s29 = smov 4  }
  0x12   :  { %34 = dma.hbm_to_vmem [thread:$0]  %s602_s1, 1024, %s29_s19, [#allocation6], %s504_s28, %s504_s28, %s505_s29  }
  0x13   :  { %s506_s7 = smov [#allocation2]   ;;  %s507_s9 = smov [#allocation7]  }
  0x14   :  { %s19_s8 = sshll.u32 %s506_s7, 4  ;;  %s42_s10 = sshll.u32 %s507_s9, 4  ;;  %s20_s8 = int_to_ptr.vmem [resolvable:$true] %s19_s8  ;;  %s43_s10 = int_to_ptr.vmem [resolvable:$true] %s42_s10 }
  0x15   :  { %s431_s13 = scalar_lea.hbm %s601_s0, 64 }
  0x16   :  { %p432_p8 = scmp.ne.s32.totalorder %s601_s0, %s431_s13  ;;  %p435_p9 = scmp.lt.u32.totalorder %s431_s13, %s601_s0 }
  0x18   :  { %p437_p10 = pnand %p435_p9, %p432_p8 }
  0x1a   :  { %440 = shalt.err (!%p437_p10)
}
  0x1b   :  { %s441_s1 = scalar_lea.vmem %s20_s8, 64  ;;  %p446_p12 = scmp.lt.s32.totalorder %s20_s8, %s20_s8 }
  0x1c   :  { %p442_p11 = scmp.ne.s32.totalorder %s20_s8, %s441_s1  ;;  %p447_p13 = scmp.lt.s32.totalorder %s441_s1, %s441_s1 }
  0x1e   :  { %p448_p0 = por %p447_p13, %p446_p12 }
  0x20   :  { %p449_p1 = pnand %p448_p0, %p442_p11 }
  0x22   :  { %452 = shalt.err (!%p449_p1)
}
  0x23   :  { %22 = dma.hbm_to_vmem [thread:$0]  %s601_s0, 64, %s20_s8, [#allocation3]  }
  0x24   :  { %s453_s22 = scalar_lea.hbm %s604_s3, 1024 }
  0x25   :  { %p454_p2 = scmp.ne.s32.totalorder %s604_s3, %s453_s22  ;;  %p457_p3 = scmp.lt.u32.totalorder %s453_s22, %s604_s3 }
  0x27   :  { %p459_p4 = pnand %p457_p3, %p454_p2 }
  0x29   :  { %462 = shalt.err (!%p459_p4)
}
  0x2a   :  { %s463_s27 = scalar_lea.vmem %s43_s10, 1024  ;;  %p468_p6 = scmp.lt.s32.totalorder %s43_s10, %s43_s10 }
  0x2b   :  { %p464_p5 = scmp.ne.s32.totalorder %s43_s10, %s463_s27  ;;  %p469_p7 = scmp.lt.s32.totalorder %s463_s27, %s463_s27 }
  0x2d   :  { %p470_p8 = por %p469_p7, %p468_p6 }
  0x2f   :  { %p471_p9 = pnand %p470_p8, %p464_p5 }
  0x31   :  { %474 = shalt.err (!%p471_p9)
}
  0x32   :  { %48 = dma.hbm_to_vmem [thread:$0]  %s604_s3, 1024, %s43_s10, [#allocation6], %s504_s28, %s504_s28, %s505_s29  }
  0x33   :  { %497 = dma.done.wait [#allocation3], 64  }
  0x34   :  { %498 = vsyncadd [#allocation3], 4294967232 }
  0x35   :  { %499 = dma.done.wait [#allocation6], 2048  }
  0x36   :  { %500 = vsyncadd [#allocation6], 4294965248  ;;  %v508_v0 = vmov 0.0   ;;  %vm509_vm0 = vmmov 0   ;;  %v391_v1 = vld [vmem:[#allocation5] sm:$0xff]   ;;  %v392_v2 = vld [vmem:[#allocation5 + $0x8] sm:$0xff]  }
  0x37   :  { %343 = vmatprep.subr.bf16.mxu0 %v508_v0  ;;  %359 = vmatprep.mubr.msk.bf16.mxu0 %vm509_vm0, %v508_v0  ;;  %v393_v3 = vld [vmem:[#allocation5 + $0x10] sm:$0xff]   ;;  %v399_v4 = vld [vmem:[#allocation7] sm:$0xff]   ;;  %v394_v5 = vld [vmem:[#allocation5 + $0x18] sm:$0xff]   ;;  %s510_s7 = smov [#allocation8]  }
  0x38   :  { %363 = vmatprep.subr.bf16.mxu1 %v508_v0  ;;  %379 = vmatprep.mubr.msk.bf16.mxu1 %vm509_vm0, %v508_v0  ;;  %v400_v6 = vld [vmem:[#allocation7 + $0x8] sm:$0xff]   ;;  %v395_v7 = vld [vmem:[#allocation5 + $0x20] sm:$0xff]   ;;  %v401_v8 = vld [vmem:[#allocation7 + $0x10] sm:$0xff]   ;;  %s297_s8 = sshll.u32 %s510_s7, 4  ;;  %s298_s8 = int_to_ptr.vmem [resolvable:$true] %s297_s8 }
  0x39   :  { %344 = vmatpush3.bf16.msra.mxu0 %v391_v1  ;;  %364 = vmatpush3.bf16.msra.mxu1 %v399_v4  ;;  %v396_v9 = vld [vmem:[#allocation5 + $0x28] sm:$0xff]   ;;  %v397_v10 = vld [vmem:[#allocation5 + $0x30] sm:$0xff]   ;;  %v398_v11 = vld [vmem:[#allocation5 + $0x38] sm:$0xff]   ;;  %p480_p11 = scmp.lt.s32.totalorder %s298_s8, %s298_s8 }
  0x3a   :  { %345 = vmatprep.subr.bf16.mxu0 %v508_v0  ;;  %365 = vmatprep.subr.bf16.mxu1 %v508_v0  ;;  %v61_v12 = vld [vmem:[#allocation2] sm:$0xf]  ;;  %v403_v14 = vld [vmem:[#allocation7 + $0x20] sm:$0xff]   ;;  %v404_v15 = vld [vmem:[#allocation7 + $0x28] sm:$0xff]  }
  0x3b   :  { %v402_v13 = vld [vmem:[#allocation7 + $0x18] sm:$0xff]   ;;  %v405_v16 = vld [vmem:[#allocation7 + $0x30] sm:$0xff]  }
  0x3c   :  { %v406_v17 = vld [vmem:[#allocation7 + $0x38] sm:$0xff]  }
  0x3d   :  { %346 = vmatpush3.bf16.msra.mxu0 %v392_v2  ;;  %366 = vmatpush3.bf16.msra.mxu1 %v400_v6  ;;  %v307_v18 = vld [vmem:[%s603_s2] ss:$0 sm:$0xff]  ;;  %s475_s2 = scalar_lea.vmem %s298_s8, 64 }
  0x3e   :  { %347 = vmatprep.subr.bf16.mxu0 %v508_v0  ;;  %367 = vmatprep.subr.bf16.mxu1 %v508_v0  ;;  %v316_v29 = vld [vmem:[%s605_s4] ss:$0 sm:$0xff]  ;;  %p476_p10 = scmp.ne.s32.totalorder %s298_s8, %s475_s2  ;;  %p481_p12 = scmp.lt.s32.totalorder %s475_s2, %s475_s2 }
  0x40   :  { %p482_p13 = por %p481_p12, %p480_p11 }
  0x41   :  { %348 = vmatpush3.bf16.msra.mxu0 %v393_v3  ;;  %368 = vmatpush3.bf16.msra.mxu1 %v401_v8 }
  0x42   :  { %349 = vmatprep.subr.bf16.mxu0 %v508_v0  ;;  %369 = vmatprep.subr.bf16.mxu1 %v508_v0  ;;  %p483_p0 = pnand %p482_p13, %p476_p10 }
  0x45   :  { %350 = vmatpush3.bf16.msra.mxu0 %v394_v5  ;;  %370 = vmatpush3.bf16.msra.mxu1 %v402_v13 }
  0x46   :  { %351 = vmatprep.subr.bf16.mxu0 %v508_v0  ;;  %371 = vmatprep.subr.bf16.mxu1 %v508_v0 }
  0x49   :  { %352 = vmatpush3.bf16.msra.mxu0 %v395_v7  ;;  %372 = vmatpush3.bf16.msra.mxu1 %v403_v14 }
  0x4a   :  { %353 = vmatprep.subr.bf16.mxu0 %v508_v0  ;;  %373 = vmatprep.subr.bf16.mxu1 %v508_v0 }
  0x4d   :  { %354 = vmatpush3.bf16.msra.mxu0 %v396_v9  ;;  %374 = vmatpush3.bf16.msra.mxu1 %v404_v15 }
  0x4e   :  { %355 = vmatprep.subr.bf16.mxu0 %v508_v0  ;;  %375 = vmatprep.subr.bf16.mxu1 %v508_v0 }
  0x51   :  { %356 = vmatpush3.bf16.msra.mxu0 %v397_v10  ;;  %376 = vmatpush3.bf16.msra.mxu1 %v405_v16 }
  0x52   :  { %357 = vmatprep.subr.bf16.mxu0 %v508_v0  ;;  %377 = vmatprep.subr.bf16.mxu1 %v508_v0 }
  0x55   :  { %358 = vmatpush3.bf16.msra.mxu0 %v398_v11  ;;  %378 = vmatpush3.bf16.msra.mxu1 %v406_v17 }
  0x58   :  { %360 = vmatmul.mubr.bf16.vlgmr.msra.gmra.mrb[0].mxu0 %v61_v12 }
 0x12b   :  { %v167_v19 = vpop.f32.mrb[0].mxu0 }
 0x12c   :  { %v168_v20 = vadd.f32 %v307_v18, %v167_v19  ;;  %v361_v21 = vpop.f32.mrb[1].mxu0 }
 0x12d   :  { %v170_v22 = vpop.f32.mrb[2].mxu0 }
 0x12e   :  { %v173_v23 = vmul.f32 0.5, %v168_v20  ;;  %v362_v24 = vpop.f32.mrb[3].mxu0 }
 0x130   :  { %407 = vtanh.f32 %v173_v23 }
 0x13a   :  { %v408_v25 = vpop.eup %407 }
 0x13b   :  { %v175_v26 = vmul.f32 0.5, %v408_v25 }
 0x13d   :  { %v176_v27 = vadd.f32 0.5, %v175_v26 }
 0x13f   :  { %v177_v28 = vpack.c.bf16 %v176_v27, %v176_v27 }
 0x141   :  { %380 = vmatmul.mubr.bf16.vlgmr.msra.gmra.mrb[0].mxu1 %v177_v28 }
 0x214   :  { %v283_v30 = vpop.f32.mrb[0].mxu1 }
 0x215   :  { %v284_v31 = vadd.f32 %v316_v29, %v283_v30  ;;  %v381_v32 = vpop.f32.mrb[1].mxu1 }
 0x216   :  { %v286_v33 = vpop.f32.mrb[2].mxu1 }
 0x217   :  { %v289_v34 = vpack.c.bf16 %v284_v31, %v284_v31  ;;  %v382_v35 = vpop.f32.mrb[3].mxu1 }
 0x219   :  { %290 = vst [vmem:[#allocation8] sm:$0xf] %v289_v34 }
 0x21a   :  { %486 = shalt.err (!%p483_p0)
}
 0x21b   :  { %s487_s4 = scalar_lea.hbm %s606_s5, 64 }
 0x21c   :  { %p488_p1 = scmp.ne.s32.totalorder %s606_s5, %s487_s4  ;;  %p491_p2 = scmp.lt.u32.totalorder %s487_s4, %s606_s5 }
 0x21e   :  { %p493_p3 = pnand %p491_p2, %p488_p1 }
 0x220   :  { %496 = shalt.err (!%p493_p3)
}
 0x221   :  { %300 = dma.vmem_to_hbm [thread:$0]  %s298_s8, 64, %s606_s5, [#allocation4]  }
 0x222   :  { %501 = dma.done.wait [#allocation4], 64  }
 0x223   :  { %502 = vsyncadd [#allocation4], 4294967232 }
 0x224   :  { %304 = vsyncpa [#allocation3], 1 }
 0x225   :  { %305 = vsyncpa [#allocation6], 1 }
 0x226   :  { %306 = vsyncpa [#allocation4], 1 }

</bundles_post_ra>
